<compile_context>
chip_gen: v7x
topology: tpu7x:2x2x1
jax: 0.10.0
libtpu: 0.0.40
codegen_flags: <defaults>
</compile_context>

<pallas_src>
import jax
import jax.numpy as jnp
import numpy as np
from jax.experimental import pallas as pl
from jax.experimental.pallas import tpu as pltpu

# ----------------------------- STFT configuration -----------------------------
N_FFT = 256          # window / FFT size
HOP = N_FFT // 2     # hop length (50% overlap -> two-chunk framing trick)
N_FREQ = N_FFT // 2  # kept frequency bins (last bin dropped, as in [:, :, :, :-1])


def _windowed_dft_basis():
    """Hann-window-folded DFT basis, fused as (N_FFT, 2*N_FREQ):
       cols [0:N_FREQ) = win*cos(2*pi*n*k/N), cols [N_FREQ:) = -win*sin(2*pi*n*k/N)."""
    k = np.arange(N_FFT)
    win = (0.5 - 0.5 * np.cos(2.0 * np.pi * k / N_FFT)).astype(np.float64)
    n = np.arange(N_FFT)[:, None]
    f = np.arange(N_FREQ)[None, :]
    ang = 2.0 * np.pi * n * f / N_FFT
    cos_m = np.cos(ang) * win[:, None]
    sin_m = -np.sin(ang) * win[:, None]
    return np.concatenate([cos_m, sin_m], axis=1).astype(np.float32)  # (N_FFT, 2*N_FREQ)


_BASIS_F32 = _windowed_dft_basis()   # float32; cast to bf16 once at call time


# ------------------------------- Pallas kernel --------------------------------
def _stft_mag_kernel(chunks_ref, w_ref, o_ref):
    # chunks_ref: (G, T+1, HOP) f32 — HOP-sized chunks of the padded waveform
    # w_ref     : (N_FFT, 2*N_FREQ) bf16 — window-folded [cos | -sin] basis (resident)
    # o_ref     : (G, T, N_FREQ) f32 — magnitude spectrogram
    g_tile = chunks_ref.shape[0]
    w = w_ref[...]
    for g in range(g_tile):                       # small static unroll (G <= 8)
        c = chunks_ref[g]                         # (T+1, HOP) f32
        a = c[:-1, :].astype(jnp.bfloat16)        # first half of each frame
        b = c[1:, :].astype(jnp.bfloat16)         # second half = next chunk
        frames = jnp.concatenate([a, b], axis=-1)                    # (T, N_FFT) bf16
        acc = jnp.dot(frames, w, preferred_element_type=jnp.float32)  # (T, 2*N_FREQ) f32
        real = acc[:, :N_FREQ]
        imag = acc[:, N_FREQ:]
        o_ref[g] = jnp.sqrt(real * real + imag * imag)


# --------------------------------- wrapper -------------------------------------
def _pick_group(bc, t):
    """Channels-per-grid-step: ~2 MiB per step, >= 2 grid steps, exact divisor of BC."""
    bytes_per_bc = (t + 1) * HOP * 4 + t * N_FREQ * 4
    target_bytes = 2 * 1024 * 1024
    g = max(1, min(8, target_bytes // bytes_per_bc))
    if bc >= 2:
        g = min(g, bc // 2)      # keep >= 2 grid steps (megacore on v7x)
    g = max(1, min(g, bc))
    while bc % g:                # need an exact divisor (no partial block / no padding)
        g -= 1
    return g


@jax.jit
def wav2spec(x):
    """x: (B, C, L) float32 waveform -> (B, C, T, N_FREQ) float32 magnitude STFT."""
    B, C, L = x.shape
    BC = B * C
    pad = N_FFT // 2
    T = L // HOP + 1  # frame count (center=True)

    # center reflect padding, then cut into HOP-chunks (no gather, no frame blow-up,
    # no duplicated copies — the kernel derives both overlapping frame halves itself)
    xp = jnp.pad(x, ((0, 0), (0, 0), (pad, pad)), mode="reflect")
    xp = xp.reshape(BC, -1)[:, : (T + 1) * HOP]
    chunks = xp.reshape(BC, T + 1, HOP)            # (BC, T+1, HOP) f32

    w = jnp.asarray(_BASIS_F32, dtype=jnp.bfloat16)  # (N_FFT, 2*N_FREQ) bf16

    G = _pick_group(BC, T)
    grid = (BC // G,)

    cost = pl.CostEstimate(
        flops=2 * BC * T * N_FFT * (2 * N_FREQ),
        transcendentals=BC * T * N_FREQ,
        bytes_accessed=BC * (T + 1) * HOP * 4 + BC * T * N_FREQ * 4
        + N_FFT * (2 * N_FREQ) * 2,
    )

    out = pl.pallas_call(
        _stft_mag_kernel,
        out_shape=jax.ShapeDtypeStruct((BC, T, N_FREQ), jnp.float32),
        grid_spec=pltpu.PrefetchScalarGridSpec(
            num_scalar_prefetch=0,
            grid=grid,
            in_specs=[
                pl.BlockSpec((G, T + 1, HOP), lambda i: (i, 0, 0)),     # waveform chunks
                pl.BlockSpec((N_FFT, 2 * N_FREQ), lambda i: (0, 0)),    # basis (resident)
            ],
            out_specs=pl.BlockSpec((G, T, N_FREQ), lambda i: (i, 0, 0)),
        ),
        compiler_params=pltpu.CompilerParams(
            dimension_semantics=("parallel",),
            vmem_limit_bytes=64 * 1024 * 1024,
        ),
        cost_estimate=cost,
    )(chunks, w)

    return out.reshape(B, C, T, N_FREQ)


# ------------------------------------ main -------------------------------------
if __name__ == "__main__":
    key = jax.random.PRNGKey(0)
    B, C, L = 2, 2, 1024
    x = jax.random.normal(key, (B, C, L), dtype=jnp.float32)

    spec = wav2spec(x)
    jax.block_until_ready(spec)

    # Full-precision reference built with explicit frame gather + f32 einsum.
    pad = N_FFT // 2
    xp = jnp.pad(x, ((0, 0), (0, 0), (pad, pad)), mode="reflect")
    T = L // HOP + 1
    starts = jnp.arange(T) * HOP
    idx = starts[:, None] + jnp.arange(N_FFT)[None, :]
    frames = xp.reshape(B * C, -1)[:, idx]                         # (BC, T, N_FFT)
    basis = jnp.asarray(_BASIS_F32)                                # window already folded in
    proj = jnp.einsum("btn,nf->btf", frames, basis)
    real = proj[..., :N_FREQ]
    imag = proj[..., N_FREQ:]
    ref = jnp.sqrt(real * real + imag * imag).reshape(B, C, T, N_FREQ)

    assert spec.shape == (B, C, T, N_FREQ), spec.shape
    max_err = float(jnp.max(jnp.abs(spec - ref)))
    scale = float(jnp.max(jnp.abs(ref))) + 1e-6
    # bf16 matmul inputs with f32 accumulation: expect ~0.3% of spectrum scale.
    assert max_err / scale < 2e-2, f"relative err {max_err / scale} (abs {max_err})"

    print("KERNEL_OK")
</pallas_src>

<mosaic_0001>
module attributes {stable_mosaic.version = 11 : i64} {
  func.func @_stft_mag_kernel(%arg0: i32, %arg1: memref<2x10x128xf32, #tpu.memory_space<vmem>>, %arg2: memref<256x256xbf16, #tpu.memory_space<vmem>>, %arg3: memref<2x9x128xf32, #tpu.memory_space<vmem>>) attributes {dimension_semantics = [#tpu.dimension_semantics<parallel>], iteration_bounds = array<i64: 2>, scalar_prefetch = 0 : i64, scratch_operands = 0 : i64, tpu.core_type = #tpu.core_type<tc>, window_params = [{transform_indices = @transform_0, window_bounds = array<i64: 2, 10, 128>}, {pipeline_mode = #tpu.pipeline_mode<synchronous>, transform_indices = @transform_1, window_bounds = array<i64: 256, 256>}, {transform_indices = @transform_2, window_bounds = array<i64: 2, 9, 128>}]} {
    %c0 = arith.constant 0 : index
    %c0_0 = arith.constant 0 : index
    %0 = vector.load %arg2[%c0, %c0_0] : memref<256x256xbf16, #tpu.memory_space<vmem>>, vector<256x256xbf16>
    %c0_1 = arith.constant 0 : index
    %c0_2 = arith.constant 0 : index
    %c0_3 = arith.constant 0 : index
    %1 = vector.load %arg1[%c0_1, %c0_2, %c0_3] : memref<2x10x128xf32, #tpu.memory_space<vmem>>, vector<1x10x128xf32>
    %2 = vector.shape_cast %1 : vector<1x10x128xf32> to vector<10x128xf32>
    %3 = vector.extract_strided_slice %2 {offsets = [0, 0], sizes = [9, 128], strides = [1, 1]} : vector<10x128xf32> to vector<9x128xf32>
    %4 = arith.truncf %3 : vector<9x128xf32> to vector<9x128xbf16>
    %5 = vector.extract_strided_slice %2 {offsets = [1, 0], sizes = [9, 128], strides = [1, 1]} : vector<10x128xf32> to vector<9x128xf32>
    %6 = arith.truncf %5 : vector<9x128xf32> to vector<9x128xbf16>
    %7 = tpu.concatenate %4, %6 in 1 : vector<9x128xbf16>, vector<9x128xbf16> -> vector<9x256xbf16>
    %cst = arith.constant dense<0.000000e+00> : vector<9x256xf32>
    %8 = tpu.matmul %7, %0, %cst {dimension_numbers = #tpu.dot_dimension_numbers<[1], [0], [0], [1], [0, 0, 1, 1], [], []>} : vector<9x256xbf16>, vector<256x256xbf16>, vector<9x256xf32> -> vector<9x256xf32>
    %9 = vector.extract_strided_slice %8 {offsets = [0, 0], sizes = [9, 128], strides = [1, 1]} : vector<9x256xf32> to vector<9x128xf32>
    %10 = vector.extract_strided_slice %8 {offsets = [0, 128], sizes = [9, 128], strides = [1, 1]} : vector<9x256xf32> to vector<9x128xf32>
    %11 = arith.mulf %9, %9 : vector<9x128xf32>
    %12 = arith.mulf %10, %10 : vector<9x128xf32>
    %13 = arith.addf %11, %12 : vector<9x128xf32>
    %14 = math.sqrt %13 : vector<9x128xf32>
    %c0_4 = arith.constant 0 : index
    %c0_5 = arith.constant 0 : index
    %c0_6 = arith.constant 0 : index
    %15 = vector.load %arg3[%c0_4, %c0_5, %c0_6] : memref<2x9x128xf32, #tpu.memory_space<vmem>>, vector<1x9x128xf32>
    %16 = vector.shape_cast %15 : vector<1x9x128xf32> to vector<9x128xf32>
    %17 = vector.shape_cast %14 : vector<9x128xf32> to vector<1x9x128xf32>
    tpu.vector_store %arg3[%c0_4, %c0_5, %c0_6], %17 {strides = array<i32>} : memref<2x9x128xf32, #tpu.memory_space<vmem>>, vector<1x9x128xf32>,
    %c1 = arith.constant 1 : index
    %c0_7 = arith.constant 0 : index
    %c0_8 = arith.constant 0 : index
    %18 = vector.load %arg1[%c1, %c0_7, %c0_8] : memref<2x10x128xf32, #tpu.memory_space<vmem>>, vector<1x10x128xf32>
    %19 = vector.shape_cast %18 : vector<1x10x128xf32> to vector<10x128xf32>
    %20 = vector.extract_strided_slice %19 {offsets = [0, 0], sizes = [9, 128], strides = [1, 1]} : vector<10x128xf32> to vector<9x128xf32>
    %21 = arith.truncf %20 : vector<9x128xf32> to vector<9x128xbf16>
    %22 = vector.extract_strided_slice %19 {offsets = [1, 0], sizes = [9, 128], strides = [1, 1]} : vector<10x128xf32> to vector<9x128xf32>
    %23 = arith.truncf %22 : vector<9x128xf32> to vector<9x128xbf16>
    %24 = tpu.concatenate %21, %23 in 1 : vector<9x128xbf16>, vector<9x128xbf16> -> vector<9x256xbf16>
    %cst_9 = arith.constant dense<0.000000e+00> : vector<9x256xf32>
    %25 = tpu.matmul %24, %0, %cst_9 {dimension_numbers = #tpu.dot_dimension_numbers<[1], [0], [0], [1], [0, 0, 1, 1], [], []>} : vector<9x256xbf16>, vector<256x256xbf16>, vector<9x256xf32> -> vector<9x256xf32>
    %26 = vector.extract_strided_slice %25 {offsets = [0, 0], sizes = [9, 128], strides = [1, 1]} : vector<9x256xf32> to vector<9x128xf32>
    %27 = vector.extract_strided_slice %25 {offsets = [0, 128], sizes = [9, 128], strides = [1, 1]} : vector<9x256xf32> to vector<9x128xf32>
    %28 = arith.mulf %26, %26 : vector<9x128xf32>
    %29 = arith.mulf %27, %27 : vector<9x128xf32>
    %30 = arith.addf %28, %29 : vector<9x128xf32>
    %31 = math.sqrt %30 : vector<9x128xf32>
    %c1_10 = arith.constant 1 : index
    %c0_11 = arith.constant 0 : index
    %c0_12 = arith.constant 0 : index
    %32 = vector.load %arg3[%c1_10, %c0_11, %c0_12] : memref<2x9x128xf32, #tpu.memory_space<vmem>>, vector<1x9x128xf32>
    %33 = vector.shape_cast %32 : vector<1x9x128xf32> to vector<9x128xf32>
    %34 = vector.shape_cast %31 : vector<9x128xf32> to vector<1x9x128xf32>
    tpu.vector_store %arg3[%c1_10, %c0_11, %c0_12], %34 {strides = array<i32>} : memref<2x9x128xf32, #tpu.memory_space<vmem>>, vector<1x9x128xf32>,
    return
  }
  func.func @transform_0(%arg0: i32) -> (i32, i32, i32) {
    %c0_i32 = arith.constant 0 : i32
    %c0_i32_0 = arith.constant 0 : i32
    %c0_i32_1 = arith.constant 0 : i32
    return %arg0, %c0_i32, %c0_i32_0 : i32, i32, i32
  }
  func.func @transform_1(%arg0: i32) -> (i32, i32) {
    %c0_i32 = arith.constant 0 : i32
    %c0_i32_0 = arith.constant 0 : i32
    %c0_i32_1 = arith.constant 0 : i32
    return %c0_i32, %c0_i32_0 : i32, i32
  }
  func.func @transform_2(%arg0: i32) -> (i32, i32, i32) {
    %c0_i32 = arith.constant 0 : i32
    %c0_i32_0 = arith.constant 0 : i32
    %c0_i32_1 = arith.constant 0 : i32
    return %arg0, %c0_i32, %c0_i32_0 : i32, i32, i32
  }
}

</mosaic_0001>

<bundles_post_ra>
// kernel: wav2spec.1
= control target key start
LH: loop header
LB: loop body
LE: loop exit
PB: predicated region body
PF: predicated region fallthrough
CT: control target
= control target key end

     0   :  { %7 = vsyncpa [#allocation3], 0  ;;  %s1178_s0 = inlined_call_operand.hbm [shape: f32[4,10,128], index: 0, kind: input, shape index: {}]   ;;  %s1179_s1 = inlined_call_operand.hbm [shape: bf16[256,256], index: 1, kind: input, shape index: {}]   ;;  %s1180_s2 = inlined_call_operand.hbm [shape: f32[4,9,128], index: 2, kind: output, shape index: {}]  }
   0x1   :  { %9 = vsyncpa [#allocation3 + $0x1], 0 }
   0x2   :  { %10 = vsyncpa [#allocation6], 0 }
   0x3   :  { %11 = vsyncpa [#allocation4], 0 }
   0x4   :  { %13 = vsyncpa [#allocation4 + $0x1], 0  ;;  %s951_s9 = smov 0   ;;  %s953_s10 = smov 0  }
   0x5   :  { %s955_s11 = smov 0   ;;  %s957_s12 = smov 0  }
   0x6 LB: > { %s972_s13 = sadd.s32 4294967295, %s927_s12   ;;  %s624_s14 = sadd.s32 4294967294, %s927_s12   ;;  %s927_s12 = sphi %s957_s12, %s1200_s12   ;;  %s923_s11 = sphi %s955_s11, %s1199_s11   ;;  %s919_s10 = sphi %s953_s10, %s1198_s10   ;;  %s915_s9 = sphi %s951_s9, %s1197_s9  }
   0x7   : > { %p39_p0 = scmp.ne.s32.totalorder %s919_s10, %s915_s9  ;;  %p1181_p1 = scmp.eq.s32.totalorder %s972_s13, 0 }
   0x8   : > { %p90_p3 = scmp.eq.s32.totalorder %s624_s14, 1  ;;  %p625_p5 = scmp.ge.s32.totalorder %s927_s12, 1 }
   0x9   : > { %p981_p4 = por %p1181_p1, %p39_p0  ;;  %p97_p7 = scmp.lt.s32.totalorder %s927_s12, 3 }
   0xa   : > { %p986_p6 = por %p90_p3, %p39_p0  ;;  %s929_s18 = smov [#allocation5]  }
   0xb   : > { %s1184_s15 = scalar_select %p981_p4, 1, 0 }
   0xc   : > { %s1185_s16 = scalar_select %p986_p6, 1, 0 }
   0xd   : > { %p991_p8 = pnand %p625_p5, %p97_p7  ;;  %s109_s19 = sshll.u32 %s929_s18, 4  ;;  %s995_s19 = int_to_ptr.vmem [resolvable:$true] %s109_s19 }
   0xe   : > { %s1007_s21 = sadd.s32 1, %s927_s12   ;;  %s26_s22 = sadd.s32 1, %s923_s11 }
   0xf   : > { %s1186_s17 = scalar_select %p991_p8, 1, 0 }
  0x10   : > { %p690_p9 = pneg %p991_p8  ;;  %s23_s23 = ssub.s32 %s927_s12, %s1007_s21 }
  0x11   : > { %s799_s26 = scalar_lea.hbm %s1179_s1, 4096 }
  0x12   : > { %p1002_p11 = pnand %p690_p9, %p1181_p1  ;;  %p800_p12 = scmp.ne.s32.totalorder %s1179_s1, %s799_s26 }
  0x13   : > { %p806_p5 = scmp.lt.u32.totalorder %s799_s26, %s1179_s1 }
  0x14   : > { %p801_p13 = pneg %p1002_p11 }
  0x16   : > { %p802_p0 = pnand %p801_p13, %p800_p12 }
  0x18   : > { %p803_p3 = pneg %p802_p0 }
  0x1a   : > { %p808_p7 = pnand %p806_p5, %p803_p3 }
  0x1c   : > { %811 = shalt.err (!%p808_p7)
}
  0x1d   : > { %s812_s3 = scalar_lea.vmem %s995_s19, 4096  ;;  %p820_p2 = scmp.lt.s32.totalorder %s995_s19, %s995_s19 }
  0x1e   : > { %p813_p9 = scmp.ne.s32.totalorder %s995_s19, %s812_s3  ;;  %p821_p6 = scmp.lt.s32.totalorder %s812_s3, %s812_s3 }
  0x20   : > { %p815_p10 = pnand %p813_p9, %p801_p13  ;;  %p822_p4 = por %p821_p6, %p820_p2 }
  0x22   : > { %p816_p1 = pneg %p815_p10 }
  0x24   : > { %p823_p8 = pnand %p822_p4, %p816_p1 }
  0x26   : > { %826 = shalt.err (!%p823_p8)
}
  0x27   : > { %s930_s4 = smov 128   ;;  %s931_s5 = smov 8  }
  0x28   : > { %693 = dma.hbm_to_vmem [thread:$0]  (!%p1002_p11), %s1179_s1, 4096, %s995_s19, [#allocation6], %s930_s4, %s930_s4, %s931_s5  }
  0x29   : > { %p24_p1 = scmp.eq.s32.totalorder %s23_s23, 0  ;;  %p33_p2 = scmp.ne.s32.totalorder %s923_s11, %s919_s10 }
  0x2a   : > { %p34_p4 = scmp.eq.s32.totalorder %s927_s12, 0  ;;  %p703_p6 = scmp.lt.s32.totalorder %s927_s12, 2 }
  0x2b   : > { %s1041_s8 = scalar_select %p24_p1, %s923_s11, %s26_s22  }
  0x2c   : > { %p35_p8 = por %p34_p4, %p33_p2  ;;  %p1188_p10 = scmp.eq.s32.totalorder %s972_s13, 1 }
  0x2d   : > { %s123_s18 = sand.u32 1, %s923_s11   ;;  %s679_s20 = sshll.u32 %s927_s12, 9 }
  0x2e   : > { %p1045_p12 = por %p1188_p10, %p33_p2  ;;  %s628_s24 = sshll.u32 %s123_s18, 5 }
  0x2f   : > { %s1054_s27 = scalar_lea.hbm %s1178_s0, %s679_s20  ;;  %s127_s19 = scalar_lea.vmem [#allocation2], %s628_s24 }
  0x30   : > { %s135_s22 = sshll.u32 %s127_s19, 4  ;;  %p1056_p11 = pnand %p703_p6, %p35_p8  ;;  %s1060_s22 = int_to_ptr.vmem [resolvable:$true] %s135_s22 }
  0x31   : > { %s1062_s28 = scalar_lea.sflag [#allocation3], %s123_s18  ;;  %s827_s29 = scalar_lea.hbm %s1054_s27, 512 }
  0x32   : > { %p828_p13 = scmp.ne.s32.totalorder %s1054_s27, %s827_s29  ;;  %p829_p0 = pneg %p1056_p11 }
  0x33   : > { %s832_s6 = scalar_lea.hbm %s1178_s0, 1024  ;;  %p833_p7 = scmp.lt.u32.totalorder %s1054_s27, %s1178_s0 }
  0x34   : > { %p830_p3 = pnand %p829_p0, %p828_p13  ;;  %p834_p9 = scmp.lt.u32.totalorder %s832_s6, %s827_s29 }
  0x35   : > { %p836_p2 = scmp.lt.u32.totalorder %s827_s29, %s1054_s27 }
  0x36   : > { %p831_p5 = pneg %p830_p3  ;;  %p835_p1 = por %p834_p9, %p833_p7 }
  0x38   : > { %p837_p4 = por %p836_p2, %p835_p1 }
  0x3a   : > { %p838_p6 = pnand %p837_p4, %p831_p5 }
  0x3c   : > { %841 = shalt.err (!%p838_p6)
}
  0x3d   : > { %s842_s18 = scalar_lea.vmem %s1060_s22, 512  ;;  %s932_s24 = smov [#allocation2]  }
  0x3e   : > { %p843_p8 = scmp.ne.s32.totalorder %s1060_s22, %s842_s18  ;;  %s847_s25 = sshll.u32 %s932_s24, 4  ;;  %s848_s25 = int_to_ptr.vmem [resolvable:$false] %s847_s25 }
  0x3f   : > { %s849_s26 = scalar_lea.vmem %s848_s25, 1024  ;;  %p850_p3 = scmp.lt.s32.totalorder %s1060_s22, %s848_s25 }
  0x40   : > { %p845_p10 = pnand %p843_p8, %p829_p0  ;;  %p851_p7 = scmp.lt.s32.totalorder %s849_s26, %s842_s18 }
  0x42   : > { %p846_p13 = pneg %p845_p10  ;;  %p852_p9 = por %p851_p7, %p850_p3 }
  0x44   : > { %p853_p1 = pnand %p852_p9, %p846_p13 }
  0x46   : > { %856 = shalt.err (!%p853_p1)
}
  0x47   : > { %697 = dma.hbm_to_vmem [thread:$0]  (!%p1056_p11), %s1054_s27, 512, %s1060_s22, %s1062_s28, %s930_s4, %s930_s4, %s931_s5  }
  0x48   : > { %p1191_p0 = scmp.ne.s32.totalorder %s1186_s17, 0 }
  0x49   : > { %s1096_s19 = sand.u32 (!%p1191_p0), 1, %s919_s10   ;;  %p1192_p5 = scmp.ne.s32.totalorder (!%p1191_p0), %s1184_s15, 0 }
  0x4a   : > { %147 = sbr.rel (%p1191_p0) target bundleno = 400 (0x190), region = 28  ;;  %s633_s29 = sshll.u32 (!%p1191_p0), %s1096_s19, 5 }
  0x4b   : > { %s150_s30 = scalar_lea.sflag (!%p1191_p0), [#allocation3], %s1096_s19  ;;  %s1102_s23 = scalar_lea.vmem (!%p1191_p0), [#allocation2], %s633_s29 }
  0x51   : > { %902 = dma.done.wait (%p1192_p5), %s150_s30, 512  }
  0x52   : > { %904 = vsyncadd (%p1192_p5), %s150_s30, 4294966784  ;;  %p1193_p11 = scmp.eq.s32.totalorder %s972_s13, 0 }
  0x54   : > { %906 = dma.done.wait (%p1193_p11), [#allocation6], 4096   ;;  %p1194_p2 = pmov %p1193_p11 }
  0x55   : > { %v743_v0 = vld [vmem:[#allocation5 + $0x4] ss:$8 sps:$4 sm:$0xff]   ;;  %v745_v1 = vld [vmem:[#allocation5] ss:$8 sps:$4 sm:$0xff]   ;;  %v746_v2 = vld [vmem:[#allocation5 + $0x14] ss:$8 sps:$4 sm:$0xff]  }
  0x56   : > { %908 = vsyncadd (%p1194_p2), [#allocation6], 4294963200  ;;  %383 = vmatprep.subr.bf16.mxu0 %v743_v0  ;;  %460 = vmatprep.subr.bf16.mxu1 %v743_v0  ;;  %v748_v3 = vld [vmem:[#allocation5 + $0x10] ss:$8 sps:$4 sm:$0xff]   ;;  %v749_v4 = vld [vmem:[#allocation5 + $0x24] ss:$8 sps:$4 sm:$0xff]  }
  0x57   : > { %384 = vmatpush1.bf16.msra.mxu0 %v745_v1  ;;  %461 = vmatpush1.bf16.msra.mxu1 %v745_v1  ;;  %v751_v5 = vld [vmem:[#allocation5 + $0x20] ss:$8 sps:$4 sm:$0xff]   ;;  %v752_v6 = vld [vmem:[#allocation5 + $0x34] ss:$8 sps:$4 sm:$0xff]   ;;  %v754_v7 = vld [vmem:[#allocation5 + $0x30] ss:$8 sps:$4 sm:$0xff]  }
  0x58   : > { %385 = vmatprep.subr.bf16.mxu0 %v746_v2  ;;  %462 = vmatprep.subr.bf16.mxu1 %v746_v2  ;;  %v755_v8 = vld [vmem:[#allocation5 + $0x44] ss:$8 sps:$4 sm:$0xff]   ;;  %v757_v9 = vld [vmem:[#allocation5 + $0x40] ss:$8 sps:$4 sm:$0xff]   ;;  %v758_v10 = vld [vmem:[#allocation5 + $0x54] ss:$8 sps:$4 sm:$0xff]  }
  0x59   : > { %v760_v11 = vld [vmem:[#allocation5 + $0x50] ss:$8 sps:$4 sm:$0xff]   ;;  %v761_v12 = vld [vmem:[#allocation5 + $0x64] ss:$8 sps:$4 sm:$0xff]   ;;  %v213_v14 = vld [vmem:[%s1102_s23 + $0x8] sm:$0x3] }
  0x5a   : > { %v212_v13 = vld [vmem:[%s1102_s23] sm:$0xff]  ;;  %v668_v16 = vld [vmem:[%s1102_s23 + $0x10] sm:$0xff]  ;;  %v669_v17 = vld [vmem:[%s1102_s23 + $0x18] sm:$0x3]  ;;  %s681_s15 = sshll.u32 %s972_s13, 9  ;;  %s177_s17 = scalar_lea.vmem [#allocation7], %s633_s29 }
  0x5b   : > { %386 = vmatpush1.bf16.msra.mxu0 %v748_v3  ;;  %463 = vmatpush1.bf16.msra.mxu1 %v748_v3  ;;  %v1114_v15 = vpack.c.bf16 %v213_v14, %v212_v13  ;;  %v763_v18 = vld [vmem:[#allocation5 + $0x60] ss:$8 sps:$4 sm:$0xff]   ;;  %v1118_v19 = vpack.c.bf16 %v669_v17, %v668_v16  ;;  %v764_v20 = vld [vmem:[#allocation5 + $0x74] ss:$8 sps:$4 sm:$0xff]   ;;  %v766_v26 = vld [vmem:[#allocation5 + $0x70] ss:$8 sps:$4 sm:$0xff]   ;;  %s1132_s13 = scalar_lea.hbm %s1180_s2, %s681_s15 }
  0x5c   : > { %387 = vmatprep.subr.bf16.mxu0 %v749_v4  ;;  %464 = vmatprep.subr.bf16.mxu1 %v749_v4  ;;  %v767_v28 = vld [vmem:[#allocation5 + $0x84] ss:$8 sps:$4 sm:$0xff]   ;;  %v769_v31 = vld [vmem:[#allocation5 + $0x80] ss:$8 sps:$4 sm:$0xff]   ;;  %v770_v32 = vld [vmem:[#allocation5 + $0x94] ss:$8 sps:$4 sm:$0xff]  }
  0x5d   : > { %v216_v21 = vshrl.u32 %v1114_v15, 16  ;;  %v218_v22 = vshll.u32 %v1114_v15, 16  ;;  %v453_v23 = vshrl.u32 %v1118_v19, 16  ;;  %v455_v24 = vshll.u32 %v1118_v19, 16  ;;  %v772_v33 = vld [vmem:[#allocation5 + $0x90] ss:$8 sps:$4 sm:$0xff]  }
  0x5e   : > { %v773_v34 = vld [vmem:[#allocation5 + $0xa4] ss:$8 sps:$4 sm:$0xff]   ;;  %v775_v35 = vld [vmem:[#allocation5 + $0xa0] ss:$8 sps:$4 sm:$0xff]   ;;  %v776_v36 = vld [vmem:[#allocation5 + $0xb4] ss:$8 sps:$4 sm:$0xff]  }
  0x5f   : > { %388 = vmatpush1.bf16.msra.mxu0 %v751_v5  ;;  %465 = vmatpush1.bf16.msra.mxu1 %v751_v5  ;;  %v220_v25 = vrot.slane %v218_v22, 1  ;;  %v457_v27 = vrot.slane %v455_v24, 1  ;;  %v778_v37 = vld [vmem:[#allocation5 + $0xb0] ss:$8 sps:$4 sm:$0xff]   ;;  %v779_v38 = vld [vmem:[#allocation5 + $0xc4] ss:$8 sps:$4 sm:$0xff]  }
  0x60   : > { %389 = vmatprep.subr.bf16.mxu0 %v752_v6  ;;  %466 = vmatprep.subr.bf16.mxu1 %v752_v6  ;;  %v781_v39 = vld [vmem:[#allocation5 + $0xc0] ss:$8 sps:$4 sm:$0xff]   ;;  %v782_v40 = vld [vmem:[#allocation5 + $0xd4] ss:$8 sps:$4 sm:$0xff]   ;;  %v784_v41 = vld [vmem:[#allocation5 + $0xd0] ss:$8 sps:$4 sm:$0xff]  }
  0x61   : > { %v221_v29 = vor.u32 %v220_v25, %v216_v21  ;;  %v458_v30 = vor.u32 %v457_v27, %v453_v23  ;;  %v785_v42 = vld [vmem:[#allocation5 + $0xe4] ss:$8 sps:$4 sm:$0xff]   ;;  %v787_v43 = vld [vmem:[#allocation5 + $0xe0] ss:$8 sps:$4 sm:$0xff]   ;;  %v788_v44 = vld [vmem:[#allocation5 + $0xf4] ss:$8 sps:$4 sm:$0xff]  }
  0x62   : > { %v790_v45 = vld [vmem:[#allocation5 + $0xf0] ss:$8 sps:$4 sm:$0xff]   ;;  %s541_s4 = sshll.u32 %s177_s17, 4  ;;  %s527_s22 = scalar_lea.sflag [#allocation4], %s1096_s19  ;;  %s1134_s4 = int_to_ptr.vmem [resolvable:$true] %s541_s4 }
  0x63   : > { %390 = vmatpush1.bf16.msra.mxu0 %v754_v7  ;;  %467 = vmatpush1.bf16.msra.mxu1 %v754_v7  ;;  %s857_s28 = scalar_lea.vmem %s1134_s4, 512  ;;  %s933_s3 = smov [#allocation7]  }
  0x64   : > { %391 = vmatprep.subr.bf16.mxu0 %v755_v8  ;;  %468 = vmatprep.subr.bf16.mxu1 %v755_v8  ;;  %p858_p4 = scmp.ne.s32.totalorder %s1134_s4, %s857_s28  ;;  %s861_s6 = sshll.u32 %s933_s3, 4  ;;  %s862_s6 = int_to_ptr.vmem [resolvable:$false] %s861_s6 }
  0x65   : > { %415 = vmatprep.mubr.bf16.mxu0 %v221_v29  ;;  %492 = vmatprep.mubr.bf16.mxu1 %v458_v30  ;;  %s863_s7 = scalar_lea.vmem %s862_s6, 1024  ;;  %p864_p10 = scmp.lt.s32.totalorder %s1134_s4, %s862_s6 }
  0x66   : > { %p859_p6 = pnand %p858_p4, %p1045_p12  ;;  %p865_p13 = scmp.lt.s32.totalorder %s863_s7, %s857_s28 }
  0x67   : > { %392 = vmatpush1.bf16.msra.mxu0 %v757_v9  ;;  %469 = vmatpush1.bf16.msra.mxu1 %v757_v9 }
  0x68   : > { %393 = vmatprep.subr.bf16.mxu0 %v758_v10  ;;  %470 = vmatprep.subr.bf16.mxu1 %v758_v10  ;;  %p860_p8 = pneg %p859_p6  ;;  %p866_p3 = por %p865_p13, %p864_p10 }
  0x6a   : > { %p867_p7 = pnand %p866_p3, %p860_p8 }
  0x6b   : > { %394 = vmatpush1.bf16.msra.mxu0 %v760_v11  ;;  %471 = vmatpush1.bf16.msra.mxu1 %v760_v11 }
  0x6c   : > { %395 = vmatprep.subr.bf16.mxu0 %v761_v12  ;;  %472 = vmatprep.subr.bf16.mxu1 %v761_v12 }
  0x6f   : > { %396 = vmatpush1.bf16.msra.mxu0 %v763_v18  ;;  %473 = vmatpush1.bf16.msra.mxu1 %v763_v18 }
  0x70   : > { %397 = vmatprep.subr.bf16.mxu0 %v764_v20  ;;  %474 = vmatprep.subr.bf16.mxu1 %v764_v20 }
  0x73   : > { %398 = vmatpush1.bf16.msra.mxu0 %v766_v26  ;;  %475 = vmatpush1.bf16.msra.mxu1 %v766_v26 }
  0x74   : > { %399 = vmatprep.subr.bf16.mxu0 %v767_v28  ;;  %476 = vmatprep.subr.bf16.mxu1 %v767_v28 }
  0x77   : > { %400 = vmatpush1.bf16.msra.mxu0 %v769_v31  ;;  %477 = vmatpush1.bf16.msra.mxu1 %v769_v31 }
  0x78   : > { %401 = vmatprep.subr.bf16.mxu0 %v770_v32  ;;  %478 = vmatprep.subr.bf16.mxu1 %v770_v32 }
  0x7b   : > { %402 = vmatpush1.bf16.msra.mxu0 %v772_v33  ;;  %479 = vmatpush1.bf16.msra.mxu1 %v772_v33 }
  0x7c   : > { %403 = vmatprep.subr.bf16.mxu0 %v773_v34  ;;  %480 = vmatprep.subr.bf16.mxu1 %v773_v34 }
  0x7f   : > { %404 = vmatpush1.bf16.msra.mxu0 %v775_v35  ;;  %481 = vmatpush1.bf16.msra.mxu1 %v775_v35 }
  0x80   : > { %405 = vmatprep.subr.bf16.mxu0 %v776_v36  ;;  %482 = vmatprep.subr.bf16.mxu1 %v776_v36 }
  0x83   : > { %406 = vmatpush1.bf16.msra.mxu0 %v778_v37  ;;  %483 = vmatpush1.bf16.msra.mxu1 %v778_v37 }
  0x84   : > { %407 = vmatprep.subr.bf16.mxu0 %v779_v38  ;;  %484 = vmatprep.subr.bf16.mxu1 %v779_v38 }
  0x87   : > { %408 = vmatpush1.bf16.msra.mxu0 %v781_v39  ;;  %485 = vmatpush1.bf16.msra.mxu1 %v781_v39 }
  0x88   : > { %409 = vmatprep.subr.bf16.mxu0 %v782_v40  ;;  %486 = vmatprep.subr.bf16.mxu1 %v782_v40 }
  0x8b   : > { %410 = vmatpush1.bf16.msra.mxu0 %v784_v41  ;;  %487 = vmatpush1.bf16.msra.mxu1 %v784_v41 }
  0x8c   : > { %411 = vmatprep.subr.bf16.mxu0 %v785_v42  ;;  %488 = vmatprep.subr.bf16.mxu1 %v785_v42 }
  0x8f   : > { %412 = vmatpush1.bf16.msra.mxu0 %v787_v43  ;;  %489 = vmatpush1.bf16.msra.mxu1 %v787_v43 }
  0x90   : > { %413 = vmatprep.subr.bf16.mxu0 %v788_v44  ;;  %490 = vmatprep.subr.bf16.mxu1 %v788_v44 }
  0x93   : > { %414 = vmatpush1.bf16.msra.mxu0 %v790_v45  ;;  %491 = vmatpush1.bf16.msra.mxu1 %v790_v45 }
  0x96   : > { %416 = vmatmul.mubr.bf16.vlgmr.msra.gmra.mrb[0].mxu0 %v1114_v15  ;;  %493 = vmatmul.mubr.bf16.vlgmr.msra.gmra.mrb[0].mxu1 %v1118_v19 }
 0x169   : > { %v417_v46 = vpop.f32.mrb[0].mxu0  ;;  %v494_v47 = vpop.f32.mrb[0].mxu1 }
 0x16a   : > { %v426_v48 = vmul.f32 %v417_v46, %v417_v46  ;;  %v503_v49 = vmul.f32 %v494_v47, %v494_v47  ;;  %v419_v50 = vpop.f32.mrb[1].mxu0  ;;  %v496_v51 = vpop.f32.mrb[1].mxu1 }
 0x16b   : > { %v428_v52 = vmul.f32 %v419_v50, %v419_v50  ;;  %v505_v53 = vmul.f32 %v496_v51, %v496_v51  ;;  %v421_v54 = vpop.f32.mrb[2].mxu0  ;;  %v498_v55 = vpop.f32.mrb[2].mxu1 }
 0x16c   : > { %v427_v56 = vmul.f32 %v421_v54, %v421_v54  ;;  %v504_v57 = vmul.f32 %v498_v55, %v498_v55  ;;  %v423_v58 = vpop.f32.mrb[3].mxu0  ;;  %v500_v59 = vpop.f32.mrb[3].mxu1 }
 0x16d   : > { %v430_v60 = vadd.f32 %v428_v52, %v426_v48  ;;  %v507_v61 = vadd.f32 %v505_v53, %v503_v49  ;;  %v429_v62 = vmul.f32 %v423_v58, %v423_v58  ;;  %v506_v63 = vmul.f32 %v500_v59, %v500_v59 }
 0x16f   : > { %791 = vrsqrt.f32 %v430_v60  ;;  %v431_v0 = vadd.f32 %v429_v62, %v427_v56  ;;  %v508_v1 = vadd.f32 %v506_v63, %v504_v57  ;;  %vm434_vm0 = vcmp.eq.f32.partialorder %v430_v60, inf }
 0x170   : > { %793 = vrsqrt.f32 %v507_v61  ;;  %v437_v5 = vand.u32 2147483648, %v430_v60  ;;  %vm436_vm1 = vcmp.eq.f32.partialorder %v430_v60, 0.0  ;;  %vm511_vm2 = vcmp.eq.f32.partialorder %v507_v61, inf }
 0x171   : > { %795 = vrsqrt.f32 %v431_v0  ;;  %v514_v8 = vand.u32 2147483648, %v507_v61  ;;  %vm513_vm3 = vcmp.eq.f32.partialorder %v507_v61, 0.0  ;;  %vm441_vm4 = vcmp.eq.f32.partialorder %v431_v0, inf }
 0x172   : > { %797 = vrsqrt.f32 %v508_v1  ;;  %v444_v15 = vand.u32 2147483648, %v431_v0  ;;  %vm443_vm5 = vcmp.eq.f32.partialorder %v431_v0, 0.0  ;;  %vm518_vm6 = vcmp.eq.f32.partialorder %v508_v1, inf }
 0x173   : > { %v521_v18 = vand.u32 2147483648, %v508_v1  ;;  %vm520_vm7 = vcmp.eq.f32.partialorder %v508_v1, 0.0 }
 0x179   : > { %v792_v2 = vpop.eup %791 }
 0x17a   : > { %v794_v3 = vpop.eup %793  ;;  %v433_v4 = vmul.f32 %v792_v2, %v430_v60 }
 0x17b   : > { %v510_v6 = vmul.f32 %v794_v3, %v507_v61  ;;  %v796_v9 = vpop.eup %795 }
 0x17c   : > { %v435_v7 = vsel %vm434_vm0, %v430_v60, %v433_v4  ;;  %v798_v12 = vpop.eup %797  ;;  %v440_v14 = vmul.f32 %v796_v9, %v431_v0 }
 0x17d   : > { %v438_v10 = vsel %vm436_vm1, %v437_v5, %v435_v7  ;;  %v512_v11 = vsel %vm511_vm2, %v507_v61, %v510_v6  ;;  %v517_v16 = vmul.f32 %v798_v12, %v508_v1 }
 0x17e   : > { %v515_v13 = vsel %vm513_vm3, %v514_v8, %v512_v11  ;;  %446 = vst [vmem:[%s177_s17] sm:$0xff] %v438_v10  ;;  %v442_v17 = vsel %vm441_vm4, %v431_v0, %v440_v14 }
 0x17f   : > { %670 = vst [vmem:[%s177_s17 + $0x10] sm:$0xff] %v515_v13  ;;  %v445_v19 = vsel %vm443_vm5, %v444_v15, %v442_v17  ;;  %v519_v20 = vsel %vm518_vm6, %v508_v1, %v517_v16 }
 0x180   : > { %447 = vst [vmem:[%s177_s17 + $0x8] sm:$0x1] %v445_v19  ;;  %v522_v21 = vsel %vm520_vm7, %v521_v18, %v519_v20 }
 0x181   : > { %671 = vst [vmem:[%s177_s17 + $0x18] sm:$0x1] %v522_v21 }
 0x182   : > { %870 = shalt.err (!%p867_p7)
}
 0x183   : > { %s871_s20 = scalar_lea.hbm %s1132_s13, 512  ;;  %s875_s25 = scalar_lea.hbm %s1180_s2, 1024 }
 0x184   : > { %p872_p9 = scmp.ne.s32.totalorder %s1132_s13, %s871_s20  ;;  %p876_p5 = scmp.lt.u32.totalorder %s1132_s13, %s1180_s2 }
 0x185   : > { %p877_p11 = scmp.lt.u32.totalorder %s875_s25, %s871_s20  ;;  %p879_p4 = scmp.lt.u32.totalorder %s871_s20, %s1132_s13 }
 0x186   : > { %p873_p1 = pnand %p872_p9, %p1045_p12 }
 0x187   : > { %p878_p2 = por %p877_p11, %p876_p5 }
 0x188   : > { %p874_p0 = pneg %p873_p1 }
 0x189   : > { %p880_p6 = por %p879_p4, %p878_p2 }
 0x18b   : > { %p881_p8 = pnand %p880_p6, %p874_p0 }
 0x18d   : > { %884 = shalt.err (!%p881_p8)
}
 0x18e   : > { %s934_s30 = smov 128   ;;  %s935_s23 = smov 8  }
 0x18f   : > { %688 = dma.vmem_to_hbm [thread:$0]  (%p1045_p12), %s1134_s4, 512, %s1132_s13, %s527_s22, %s934_s30, %s934_s30, %s935_s23  }
 0x190 PF: > { %s556_s15 = sand.u32 1, %s915_s9   ;;  %p1195_p10 = scmp.ne.s32.totalorder %s1185_s16, 0 }
 0x191   : > { %p1196_p13 = scmp.ge.s32.totalorder %s927_s12, 2  ;;  %s557_s17 = scalar_lea.sflag [#allocation4], %s556_s15 }
 0x193   : > { %p699_p3 = pnand %p1196_p13, %p1195_p10 }
 0x195   : > { %910 = dma.done.wait (!%p699_p3), %s557_s17, 512  }
 0x196   : > { %912 = vsyncadd (!%p699_p3), %s557_s17, 4294966784  ;;  %p16_p7 = scmp.ge.s32.totalorder %s1007_s21, 4   ;;  %s1197_s9 = smov %s919_s10 }
 0x197   : > { %s1198_s10 = smov %s923_s11  ;;  %s1199_s11 = smov %s1041_s8 }
 0x198   : > { %s1200_s12 = smov %s1007_s21  ;;  %18 = sbr.rel (!%p16_p7) target bundleno = 6 (0x6), region = 79 }
 0x19f   :  { %562 = vsyncpa [#allocation3], 1 }
 0x1a0   :  { %564 = vsyncpa [#allocation3 + $0x1], 1 }
 0x1a1   :  { %565 = vsyncpa [#allocation6], 1 }
 0x1a2   :  { %566 = vsyncpa [#allocation4], 1 }
 0x1a3   :  { %568 = vsyncpa [#allocation4 + $0x1], 1 }

</bundles_post_ra>
